<compile_context>
chip_gen: v7x
topology: tpu7x:2x2x1
jax: 0.10.0
libtpu: 0.0.40
codegen_flags: <defaults>
</compile_context>

<pallas_src>
import functools

import jax
import jax.numpy as jnp
from jax.experimental import pallas as pl
from jax.experimental.pallas import tpu as pltpu


def _make_ncf_kernel(num_layers: int, mf_dim: int):
    """Fused NCF kernel for `num_layers` MLP linears (>= 1)."""

    def kernel(*refs):
        # ---- parse refs --------------------------------------------------
        u_ref, i_ref, w0u_ref, w0i_ref, b0_ref = refs[:5]
        idx = 5
        rest_layers = []
        for _ in range(num_layers - 1):
            rest_layers.append((refs[idx], refs[idx + 1]))
            idx += 2
        wf_g_ref, wf_m_ref, bf_ref, out_ref = refs[idx:idx + 4]

        f32 = jnp.float32

        # Activations arrive as [mf_dim + d_half, TB]; upcast once so every
        # slice / matmul below runs in f32 (no per-layer re-quantization).
        u = u_ref[...].astype(f32)
        i = i_ref[...].astype(f32)

        # ---- GMF branch: elementwise product (VPU) ------------------------
        gmf_x = u[:mf_dim] * i[:mf_dim]                                    # [mf, TB]

        # ---- MLP branch: first layer with split weights (no in-kernel concat)
        h = (jnp.dot(w0u_ref[...], u[mf_dim:], preferred_element_type=f32)
             + jnp.dot(w0i_ref[...], i[mf_dim:], preferred_element_type=f32))
        h = jnp.maximum(h + b0_ref[...], 0.0)                              # [out0, TB]
        for w_ref, b_ref in rest_layers:
            h = jnp.dot(w_ref[...], h, preferred_element_type=f32)
            h = jnp.maximum(h + b_ref[...], 0.0)

        # ---- final layer as multiply + sublane reduce (no N=1 matmul) -----
        logits = (jnp.sum(gmf_x * wf_g_ref[...], axis=0, keepdims=True)
                  + jnp.sum(h * wf_m_ref[...], axis=0, keepdims=True)
                  + bf_ref[...])                                           # [1, TB]
        out_ref[...] = jax.nn.sigmoid(logits)                              # lane-dense

    return kernel


def ncf_forward(user_idxs, item_idxs, params, *, block_batch=4096, use_bf16=False):
    """NCF forward. Embedding gather is JAX glue; the rest is one Pallas kernel."""
    f32 = jnp.float32
    act_dtype = jnp.bfloat16 if use_bf16 else f32
    assert block_batch % 128 == 0, "block_batch must be a multiple of 128"

    gmf_user, gmf_item = params["gmf_user_embed"], params["gmf_item_embed"]
    mlp_user, mlp_item = params["mlp_user_embed"], params["mlp_item_embed"]
    mlp_ws, mlp_bs = params["mlp_weights"], params["mlp_biases"]
    wf, bf = params["final_weight"], params["final_bias"]

    mf_dim = gmf_user.shape[1]
    d_half = mlp_user.shape[1]
    feat = mf_dim + d_half
    assert len(mlp_ws) >= 1

    # ---- adaptive batch tiling -------------------------------------------
    batch = user_idxs.shape[0]
    b_128 = -(-batch // 128) * 128
    tb = min(block_batch, b_128)                 # multiple of 128, no over-padding
    b_pad = -(-b_128 // tb) * tb
    num_tiles = b_pad // tb
    pad = b_pad - batch
    if pad:
        user_idxs = jnp.pad(user_idxs, (0, pad))
        item_idxs = jnp.pad(item_idxs, (0, pad))

    # ---- glue: gather directly into [features, batch] layout --------------
    # Per-user / per-item tables concatenated + transposed once (parameter-sized
    # work, independent of batch), so the batch gather lands in the kernel
    # layout with no extra transpose / concat pass over the activations.
    user_tab_t = jnp.concatenate([gmf_user, mlp_user], axis=1).T.astype(act_dtype)
    item_tab_t = jnp.concatenate([gmf_item, mlp_item], axis=1).T.astype(act_dtype)
    u_act = jnp.take(user_tab_t, user_idxs, axis=1)      # [feat, b_pad]
    i_act = jnp.take(item_tab_t, item_idxs, axis=1)      # [feat, b_pad]

    # ---- grid-resident parameters (f32, native (out, in) layout) ----------
    w0 = mlp_ws[0].astype(f32)
    inputs = [u_act, i_act,
              w0[:, :d_half], w0[:, d_half:],
              mlp_bs[0].reshape(-1, 1).astype(f32)]
    for w, b in zip(mlp_ws[1:], mlp_bs[1:]):
        inputs.append(w.astype(f32))                      # (out, in)
        inputs.append(b.reshape(-1, 1).astype(f32))       # (out, 1)
    inputs.append(wf[:, :mf_dim].T.astype(f32))           # (mf_dim, 1)   GMF half
    inputs.append(wf[:, mf_dim:].T.astype(f32))           # (last_hid, 1) MLP half
    inputs.append(bf.reshape(1, 1).astype(f32))           # (1, 1)

    def act_spec():
        return pl.BlockSpec((feat, tb), lambda i: (0, i))   # batch-tiled slab

    def resident_spec(x):
        return pl.BlockSpec(x.shape, lambda i: (0, 0))       # VMEM-resident

    in_specs = [act_spec(), act_spec()] + [resident_spec(x) for x in inputs[2:]]

    # ---- advisory cost estimate (helps XLA overlap the gather glue) -------
    flops = sum(2 * w.shape[0] * w.shape[1] for w in mlp_ws) * b_pad
    flops += b_pad * (mf_dim + 2 * (mf_dim + mlp_ws[-1].shape[0]))
    act_bytes = 2 * feat * b_pad * jnp.dtype(act_dtype).itemsize + b_pad * 4
    w_bytes = sum(int(x.size) * 4 for x in inputs[2:])
    cost = pl.CostEstimate(flops=int(flops), transcendentals=int(b_pad),
                           bytes_accessed=int(act_bytes + w_bytes))

    out = pl.pallas_call(
        _make_ncf_kernel(len(mlp_ws), mf_dim),
        out_shape=jax.ShapeDtypeStruct((1, b_pad), f32),
        grid=(num_tiles,),
        in_specs=in_specs,
        out_specs=pl.BlockSpec((1, tb), lambda i: (0, i)),
        compiler_params=pltpu.CompilerParams(
            dimension_semantics=("parallel",),
            vmem_limit_bytes=48 * 1024 * 1024),
        cost_estimate=cost,
    )(*inputs)

    return out.reshape(-1)[:batch]


def init_params(key, num_users, num_items, mf_dim, mlp_layers):
    """Deterministic synthetic parameter init (shapes match the torch module)."""
    keys = jax.random.split(key, 16)
    k = iter(keys)
    p = {}
    p["gmf_user_embed"] = 0.1 * jax.random.normal(next(k), (num_users, mf_dim), jnp.float32)
    p["gmf_item_embed"] = 0.1 * jax.random.normal(next(k), (num_items, mf_dim), jnp.float32)
    p["mlp_user_embed"] = 0.1 * jax.random.normal(next(k), (num_users, mlp_layers[0] // 2), jnp.float32)
    p["mlp_item_embed"] = 0.1 * jax.random.normal(next(k), (num_items, mlp_layers[0] // 2), jnp.float32)
    ws, bs = [], []
    for in_f, out_f in zip(mlp_layers, mlp_layers[1:]):
        ws.append(0.1 * jax.random.normal(next(k), (out_f, in_f), jnp.float32))
        bs.append(0.01 * jax.random.normal(next(k), (out_f,), jnp.float32))
    p["mlp_weights"] = ws
    p["mlp_biases"] = bs
    p["final_weight"] = 0.1 * jax.random.normal(next(k), (1, mf_dim + mlp_layers[-1]), jnp.float32)
    p["final_bias"] = 0.01 * jax.random.normal(next(k), (1,), jnp.float32)
    return p


def ncf_reference(user_idxs, item_idxs, params):
    """Pure-JAX reference mirroring the PyTorch forward exactly."""
    gmf_u = jnp.take(params["gmf_user_embed"], user_idxs, axis=0)
    gmf_i = jnp.take(params["gmf_item_embed"], item_idxs, axis=0)
    mlp_u = jnp.take(params["mlp_user_embed"], user_idxs, axis=0)
    mlp_i = jnp.take(params["mlp_item_embed"], item_idxs, axis=0)
    gmf_x = gmf_u * gmf_i
    mlp_x = jnp.concatenate([mlp_u, mlp_i], axis=-1)
    for w, b in zip(params["mlp_weights"], params["mlp_biases"]):
        mlp_x = jnp.maximum(mlp_x @ w.T + b, 0.0)
    x = jnp.concatenate([gmf_x, mlp_x], axis=-1)
    logits = x @ params["final_weight"].T + params["final_bias"]
    return jax.nn.sigmoid(logits).reshape(-1)


if __name__ == "__main__":
    num_users, num_items = 32, 48
    mf_dim = 8
    mlp_layers = [16, 32, 16, 8]   # reg_layers only affect embedding norm_type (no forward effect)

    key = jax.random.PRNGKey(0)
    kp, ku, ki = jax.random.split(key, 3)
    params = init_params(kp, num_users, num_items, mf_dim, mlp_layers)

    # --- test A: small batch, f32 path (exact vs reference) ---------------
    batch = 8
    user_idxs = jax.random.randint(ku, (batch,), 0, num_users, dtype=jnp.int32)
    item_idxs = jax.random.randint(ki, (batch,), 0, num_items, dtype=jnp.int32)
    ref = jax.block_until_ready(ncf_reference(user_idxs, item_idxs, params))

    fwd_f32 = jax.jit(functools.partial(ncf_forward, use_bf16=False))
    preds = jax.block_until_ready(fwd_f32(user_idxs, item_idxs, params))
    assert preds.shape == (batch,)
    assert jnp.allclose(preds, ref, atol=1e-5, rtol=1e-5), (preds, ref)

    # --- test B: multi-tile grid (padding + batch tiling path) ------------
    batch_b = 300
    ku2, ki2 = jax.random.split(jax.random.PRNGKey(1))
    u_b = jax.random.randint(ku2, (batch_b,), 0, num_users, dtype=jnp.int32)
    i_b = jax.random.randint(ki2, (batch_b,), 0, num_items, dtype=jnp.int32)
    ref_b = jax.block_until_ready(ncf_reference(u_b, i_b, params))
    fwd_tiled = jax.jit(functools.partial(ncf_forward, block_batch=128, use_bf16=False))
    preds_b = jax.block_until_ready(fwd_tiled(u_b, i_b, params))
    assert preds_b.shape == (batch_b,)
    assert jnp.allclose(preds_b, ref_b, atol=1e-5, rtol=1e-5), (preds_b, ref_b)

    # --- test C: bf16 activation-storage path (looser tolerance) ----------
    fwd_bf16 = jax.jit(functools.partial(ncf_forward, use_bf16=True))
    preds_bf16 = jax.block_until_ready(fwd_bf16(user_idxs, item_idxs, params))
    assert preds_bf16.shape == (batch,)
    assert jnp.allclose(preds_bf16, ref, atol=2e-2, rtol=0.0), (preds_bf16, ref)

    print("KERNEL_OK")
</pallas_src>

<mosaic_0001>
module attributes {stable_mosaic.version = 11 : i64} {
  func.func @kernel(%arg0: i32, %arg1: memref<16x128xf32, #tpu.memory_space<vmem>>, %arg2: memref<16x128xf32, #tpu.memory_space<vmem>>, %arg3: memref<32x8xf32, #tpu.memory_space<vmem>>, %arg4: memref<32x8xf32, #tpu.memory_space<vmem>>, %arg5: memref<32x1xf32, #tpu.memory_space<vmem>>, %arg6: memref<16x32xf32, #tpu.memory_space<vmem>>, %arg7: memref<16x1xf32, #tpu.memory_space<vmem>>, %arg8: memref<8x16xf32, #tpu.memory_space<vmem>>, %arg9: memref<8x1xf32, #tpu.memory_space<vmem>>, %arg10: memref<8x1xf32, #tpu.memory_space<vmem>>, %arg11: memref<8x1xf32, #tpu.memory_space<vmem>>, %arg12: memref<1x1xf32, #tpu.memory_space<vmem>>, %arg13: memref<1x128xf32, #tpu.memory_space<vmem>>) attributes {dimension_semantics = [#tpu.dimension_semantics<parallel>], iteration_bounds = array<i64: 1>, scalar_prefetch = 0 : i64, scratch_operands = 0 : i64, tpu.core_type = #tpu.core_type<tc>, window_params = [{transform_indices = @transform_0, window_bounds = array<i64: 16, 128>}, {transform_indices = @transform_1, window_bounds = array<i64: 16, 128>}, {pipeline_mode = #tpu.pipeline_mode<synchronous>, transform_indices = @transform_2, window_bounds = array<i64: 32, 8>}, {pipeline_mode = #tpu.pipeline_mode<synchronous>, transform_indices = @transform_3, window_bounds = array<i64: 32, 8>}, {pipeline_mode = #tpu.pipeline_mode<synchronous>, transform_indices = @transform_4, window_bounds = array<i64: 32, 1>}, {pipeline_mode = #tpu.pipeline_mode<synchronous>, transform_indices = @transform_5, window_bounds = array<i64: 16, 32>}, {pipeline_mode = #tpu.pipeline_mode<synchronous>, transform_indices = @transform_6, window_bounds = array<i64: 16, 1>}, {pipeline_mode = #tpu.pipeline_mode<synchronous>, transform_indices = @transform_7, window_bounds = array<i64: 8, 16>}, {pipeline_mode = #tpu.pipeline_mode<synchronous>, transform_indices = @transform_8, window_bounds = array<i64: 8, 1>}, {pipeline_mode = #tpu.pipeline_mode<synchronous>, transform_indices = @transform_9, window_bounds = array<i64: 8, 1>}, {pipeline_mode = #tpu.pipeline_mode<synchronous>, transform_indices = @transform_10, window_bounds = array<i64: 8, 1>}, {pipeline_mode = #tpu.pipeline_mode<synchronous>, transform_indices = @transform_11, window_bounds = array<i64: 1, 1>}, {transform_indices = @transform_12, window_bounds = array<i64: 1, 128>}]} {
    %c0 = arith.constant 0 : index
    %c0_0 = arith.constant 0 : index
    %0 = vector.load %arg1[%c0, %c0_0] : memref<16x128xf32, #tpu.memory_space<vmem>>, vector<16x128xf32>
    %c0_1 = arith.constant 0 : index
    %c0_2 = arith.constant 0 : index
    %1 = vector.load %arg2[%c0_1, %c0_2] : memref<16x128xf32, #tpu.memory_space<vmem>>, vector<16x128xf32>
    %2 = vector.extract_strided_slice %0 {offsets = [0, 0], sizes = [8, 128], strides = [1, 1]} : vector<16x128xf32> to vector<8x128xf32>
    %3 = vector.extract_strided_slice %1 {offsets = [0, 0], sizes = [8, 128], strides = [1, 1]} : vector<16x128xf32> to vector<8x128xf32>
    %4 = arith.mulf %2, %3 : vector<8x128xf32>
    %c0_3 = arith.constant 0 : index
    %c0_4 = arith.constant 0 : index
    %5 = vector.load %arg3[%c0_3, %c0_4] : memref<32x8xf32, #tpu.memory_space<vmem>>, vector<32x8xf32>
    %6 = vector.extract_strided_slice %0 {offsets = [8, 0], sizes = [8, 128], strides = [1, 1]} : vector<16x128xf32> to vector<8x128xf32>
    %cst = arith.constant dense<0.000000e+00> : vector<32x128xf32>
    %7 = tpu.matmul %5, %6, %cst {dimension_numbers = #tpu.dot_dimension_numbers<[1], [0], [0], [1], [0, 0, 1, 1], [], []>} : vector<32x8xf32>, vector<8x128xf32>, vector<32x128xf32> -> vector<32x128xf32>
    %c0_5 = arith.constant 0 : index
    %c0_6 = arith.constant 0 : index
    %8 = vector.load %arg4[%c0_5, %c0_6] : memref<32x8xf32, #tpu.memory_space<vmem>>, vector<32x8xf32>
    %9 = vector.extract_strided_slice %1 {offsets = [8, 0], sizes = [8, 128], strides = [1, 1]} : vector<16x128xf32> to vector<8x128xf32>
    %cst_7 = arith.constant dense<0.000000e+00> : vector<32x128xf32>
    %10 = tpu.matmul %8, %9, %cst_7 {dimension_numbers = #tpu.dot_dimension_numbers<[1], [0], [0], [1], [0, 0, 1, 1], [], []>} : vector<32x8xf32>, vector<8x128xf32>, vector<32x128xf32> -> vector<32x128xf32>
    %11 = arith.addf %7, %10 : vector<32x128xf32>
    %c0_8 = arith.constant 0 : index
    %c0_9 = arith.constant 0 : index
    %12 = vector.load %arg5[%c0_8, %c0_9] : memref<32x1xf32, #tpu.memory_space<vmem>>, vector<32x1xf32>
    %13 = vector.broadcast %12 : vector<32x1xf32> to vector<32x128xf32>
    %14 = arith.addf %11, %13 : vector<32x128xf32>
    %cst_10 = arith.constant 0.000000e+00 : f32
    %15 = vector.broadcast %cst_10 : f32 to vector<32x128xf32>
    %16 = arith.maximumf %14, %15 : vector<32x128xf32>
    %c0_11 = arith.constant 0 : index
    %c0_12 = arith.constant 0 : index
    %17 = vector.load %arg6[%c0_11, %c0_12] : memref<16x32xf32, #tpu.memory_space<vmem>>, vector<16x32xf32>
    %cst_13 = arith.constant dense<0.000000e+00> : vector<16x128xf32>
    %18 = tpu.matmul %17, %16, %cst_13 {dimension_numbers = #tpu.dot_dimension_numbers<[1], [0], [0], [1], [0, 0, 1, 1], [], []>} : vector<16x32xf32>, vector<32x128xf32>, vector<16x128xf32> -> vector<16x128xf32>
    %c0_14 = arith.constant 0 : index
    %c0_15 = arith.constant 0 : index
    %19 = vector.load %arg7[%c0_14, %c0_15] : memref<16x1xf32, #tpu.memory_space<vmem>>, vector<16x1xf32>
    %20 = vector.broadcast %19 : vector<16x1xf32> to vector<16x128xf32>
    %21 = arith.addf %18, %20 : vector<16x128xf32>
    %cst_16 = arith.constant 0.000000e+00 : f32
    %22 = vector.broadcast %cst_16 : f32 to vector<16x128xf32>
    %23 = arith.maximumf %21, %22 : vector<16x128xf32>
    %c0_17 = arith.constant 0 : index
    %c0_18 = arith.constant 0 : index
    %24 = vector.load %arg8[%c0_17, %c0_18] : memref<8x16xf32, #tpu.memory_space<vmem>>, vector<8x16xf32>
    %cst_19 = arith.constant dense<0.000000e+00> : vector<8x128xf32>
    %25 = tpu.matmul %24, %23, %cst_19 {dimension_numbers = #tpu.dot_dimension_numbers<[1], [0], [0], [1], [0, 0, 1, 1], [], []>} : vector<8x16xf32>, vector<16x128xf32>, vector<8x128xf32> -> vector<8x128xf32>
    %c0_20 = arith.constant 0 : index
    %c0_21 = arith.constant 0 : index
    %26 = vector.load %arg9[%c0_20, %c0_21] : memref<8x1xf32, #tpu.memory_space<vmem>>, vector<8x1xf32>
    %27 = vector.broadcast %26 : vector<8x1xf32> to vector<8x128xf32>
    %28 = arith.addf %25, %27 : vector<8x128xf32>
    %cst_22 = arith.constant 0.000000e+00 : f32
    %29 = vector.broadcast %cst_22 : f32 to vector<8x128xf32>
    %30 = arith.maximumf %28, %29 : vector<8x128xf32>
    %c0_23 = arith.constant 0 : index
    %c0_24 = arith.constant 0 : index
    %31 = vector.load %arg10[%c0_23, %c0_24] : memref<8x1xf32, #tpu.memory_space<vmem>>, vector<8x1xf32>
    %32 = vector.broadcast %31 : vector<8x1xf32> to vector<8x128xf32>
    %33 = arith.mulf %4, %32 : vector<8x128xf32>
    %cst_25 = arith.constant dense<0.000000e+00> : vector<128xf32>
    %34 = vector.multi_reduction <add>, %33, %cst_25 [0] : vector<8x128xf32> to vector<128xf32>
    %35 = vector.shape_cast %34 : vector<128xf32> to vector<1x128xf32>
    %c0_26 = arith.constant 0 : index
    %c0_27 = arith.constant 0 : index
    %36 = vector.load %arg11[%c0_26, %c0_27] : memref<8x1xf32, #tpu.memory_space<vmem>>, vector<8x1xf32>
    %37 = vector.broadcast %36 : vector<8x1xf32> to vector<8x128xf32>
    %38 = arith.mulf %30, %37 : vector<8x128xf32>
    %cst_28 = arith.constant dense<0.000000e+00> : vector<128xf32>
    %39 = vector.multi_reduction <add>, %38, %cst_28 [0] : vector<8x128xf32> to vector<128xf32>
    %40 = vector.shape_cast %39 : vector<128xf32> to vector<1x128xf32>
    %41 = arith.addf %35, %40 : vector<1x128xf32>
    %c0_29 = arith.constant 0 : index
    %c0_30 = arith.constant 0 : index
    %42 = vector.load %arg12[%c0_29, %c0_30] : memref<1x1xf32, #tpu.memory_space<vmem>>, vector<1x1xf32>
    %43 = vector.broadcast %42 : vector<1x1xf32> to vector<1x128xf32>
    %44 = arith.addf %41, %43 : vector<1x128xf32>
    %45 = arith.negf %44 : vector<1x128xf32>
    %46 = math.exp %45 : vector<1x128xf32>
    %cst_31 = arith.constant 1.000000e+00 : f32
    %47 = vector.broadcast %cst_31 : f32 to vector<1x128xf32>
    %48 = arith.addf %47, %46 : vector<1x128xf32>
    %49 = arith.divf %47, %48 : vector<1x128xf32>
    %c0_32 = arith.constant 0 : index
    %c0_33 = arith.constant 0 : index
    %50 = vector.load %arg13[%c0_32, %c0_33] : memref<1x128xf32, #tpu.memory_space<vmem>>, vector<1x128xf32>
    tpu.vector_store %arg13[%c0_32, %c0_33], %49 {strides = array<i32>} : memref<1x128xf32, #tpu.memory_space<vmem>>, vector<1x128xf32>,
    return
  }
  func.func @transform_0(%arg0: i32) -> (i32, i32) {
    %c0_i32 = arith.constant 0 : i32
    %c0_i32_0 = arith.constant 0 : i32
    return %c0_i32, %arg0 : i32, i32
  }
  func.func @transform_1(%arg0: i32) -> (i32, i32) {
    %c0_i32 = arith.constant 0 : i32
    %c0_i32_0 = arith.constant 0 : i32
    return %c0_i32, %arg0 : i32, i32
  }
  func.func @transform_2(%arg0: i32) -> (i32, i32) {
    %c0_i32 = arith.constant 0 : i32
    %c0_i32_0 = arith.constant 0 : i32
    %c0_i32_1 = arith.constant 0 : i32
    return %c0_i32, %c0_i32_0 : i32, i32
  }
  func.func @transform_3(%arg0: i32) -> (i32, i32) {
    %c0_i32 = arith.constant 0 : i32
    %c0_i32_0 = arith.constant 0 : i32
    %c0_i32_1 = arith.constant 0 : i32
    return %c0_i32, %c0_i32_0 : i32, i32
  }
  func.func @transform_4(%arg0: i32) -> (i32, i32) {
    %c0_i32 = arith.constant 0 : i32
    %c0_i32_0 = arith.constant 0 : i32
    %c0_i32_1 = arith.constant 0 : i32
    return %c0_i32, %c0_i32_0 : i32, i32
  }
  func.func @transform_5(%arg0: i32) -> (i32, i32) {
    %c0_i32 = arith.constant 0 : i32
    %c0_i32_0 = arith.constant 0 : i32
    %c0_i32_1 = arith.constant 0 : i32
    return %c0_i32, %c0_i32_0 : i32, i32
  }
  func.func @transform_6(%arg0: i32) -> (i32, i32) {
    %c0_i32 = arith.constant 0 : i32
    %c0_i32_0 = arith.constant 0 : i32
    %c0_i32_1 = arith.constant 0 : i32
    return %c0_i32, %c0_i32_0 : i32, i32
  }
  func.func @transform_7(%arg0: i32) -> (i32, i32) {
    %c0_i32 = arith.constant 0 : i32
    %c0_i32_0 = arith.constant 0 : i32
    %c0_i32_1 = arith.constant 0 : i32
    return %c0_i32, %c0_i32_0 : i32, i32
  }
  func.func @transform_8(%arg0: i32) -> (i32, i32) {
    %c0_i32 = arith.constant 0 : i32
    %c0_i32_0 = arith.constant 0 : i32
    %c0_i32_1 = arith.constant 0 : i32
    return %c0_i32, %c0_i32_0 : i32, i32
  }
  func.func @transform_9(%arg0: i32) -> (i32, i32) {
    %c0_i32 = arith.constant 0 : i32
    %c0_i32_0 = arith.constant 0 : i32
    %c0_i32_1 = arith.constant 0 : i32
    return %c0_i32, %c0_i32_0 : i32, i32
  }
  func.func @transform_10(%arg0: i32) -> (i32, i32) {
    %c0_i32 = arith.constant 0 : i32
    %c0_i32_0 = arith.constant 0 : i32
    %c0_i32_1 = arith.constant 0 : i32
    return %c0_i32, %c0_i32_0 : i32, i32
  }
  func.func @transform_11(%arg0: i32) -> (i32, i32) {
    %c0_i32 = arith.constant 0 : i32
    %c0_i32_0 = arith.constant 0 : i32
    %c0_i32_1 = arith.constant 0 : i32
    return %c0_i32, %c0_i32_0 : i32, i32
  }
  func.func @transform_12(%arg0: i32) -> (i32, i32) {
    %c0_i32 = arith.constant 0 : i32
    %c0_i32_0 = arith.constant 0 : i32
    return %c0_i32, %arg0 : i32, i32
  }
}

</mosaic_0001>

<bundles_post_ra>
// kernel: ncf_forward.1
= control target key start
LH: loop header
LB: loop body
LE: loop exit
PB: predicated region body
PF: predicated region fallthrough
CT: control target
= control target key end

     0   :  { %vm56_vm0 = vcmask 64512   ;;  %v602_v2 = vmov 0   ;;  %vm297_vm1 = vcmask 261120   ;;  %v603_v45 = vmov 0.0|0.0   ;;  %s759_s1 = inlined_call_operand.vmem [shape: f32[16,128], index: 1, kind: input, shape index: {}]   ;;  %s760_s3 = inlined_call_operand.vmem [shape: f32[32,8], index: 3, kind: input, shape index: {}]   ;;  %s761_s0 = inlined_call_operand.vmem [shape: f32[16,128], index: 0, kind: input, shape index: {}]   ;;  %s762_s11 = inlined_call_operand.<no memory space> [shape: f32[1,1], index: 11, kind: input, shape index: {}]   ;;  %s763_s4 = inlined_call_operand.vmem [shape: f32[32,1], index: 4, kind: input, shape index: {}]   ;;  %s764_s2 = inlined_call_operand.vmem [shape: f32[32,8], index: 2, kind: input, shape index: {}]   ;;  %s765_s6 = inlined_call_operand.vmem [shape: f32[16,1], index: 6, kind: input, shape index: {}]   ;;  %s766_s8 = inlined_call_operand.vmem [shape: f32[8,1], index: 8, kind: input, shape index: {}]   ;;  %s767_s9 = inlined_call_operand.vmem [shape: f32[8,1], index: 9, kind: input, shape index: {}]   ;;  %s768_s10 = inlined_call_operand.vmem [shape: f32[8,1], index: 10, kind: input, shape index: {}]   ;;  %s769_s5 = inlined_call_operand.vmem [shape: f32[16,32], index: 5, kind: input, shape index: {}]   ;;  %s770_s7 = inlined_call_operand.vmem [shape: f32[8,16], index: 7, kind: input, shape index: {}]   ;;  %s771_s12 = inlined_call_operand.vmem [shape: f32[1,128], index: 12, kind: output, shape index: {}]  }
   0x1   :  { %v46_v0 = vld [vmem:[%s759_s1 + $0x8] sm:$0xff]  ;;  %v52_v1 = vld [vmem:[%s760_s3] sm:$0xff]  ;;  %596 = vset.pattern.permute.xlu0 %v602_v2  ;;  %597 = vset.pattern.permute.xlu1 %v602_v2  ;;  %v17_v3 = vstv %s762_s11  ;;  %v54_v6 = vld [vmem:[%s760_s3 + $0x10] sm:$0xff]  ;;  %vm604_vm2 = vmmov 0   ;;  %v605_v46 = vmov 0.0   ;;  %vm388_vm3 = vcmask 130048  }
   0x2   :  { %543 = vmatprep.subr.mxu0 %v46_v0  ;;  %545 = vmatprep.mubr.msk.f32.mxu0 %vm56_vm0, %v52_v1  ;;  %v53_v4 = vld [vmem:[%s760_s3 + $0x8] sm:$0xff]  ;;  %18 = vst [vmem:[#allocation2] sm:$0x1] %v17_v3  ;;  %v251_v7 = vld [vmem:[%s763_s4] sm:$0xff]  ;;  %v55_v8 = vld [vmem:[%s760_s3 + $0x18] sm:$0xff] }
   0x3   :  { %v44_v5 = vld [vmem:[%s761_s0 + $0x8] sm:$0xff]  ;;  %544 = vmatpush3.msra.mxu0 %v46_v0  ;;  %v253_v9 = vld [vmem:[%s763_s4 + $0x10] sm:$0xff]  ;;  %v48_v10 = vld [vmem:[%s764_s2] sm:$0xff]  ;;  %257 = vperm.xlu0 %596, %v251_v7  }
   0x4   :  { %546 = vmatmul.mubr.msk.f32.vlgmr.msra.gmra.mrb[0].mxu0 %vm56_vm0, %v53_v4  ;;  %551 = vmatprep.subr.mxu0 %v44_v5  ;;  %v252_v11 = vld [vmem:[%s763_s4 + $0x8] sm:$0xff]  ;;  %v254_v12 = vld [vmem:[%s763_s4 + $0x18] sm:$0xff]  ;;  %v50_v14 = vld [vmem:[%s764_s2 + $0x10] sm:$0xff] }
   0x5   :  { %552 = vmatpush3.msra.mxu0 %v44_v5  ;;  %548 = vmatprep.mubr.msk.f32.mxu0 %vm56_vm0, %v54_v6  ;;  %v49_v13 = vld [vmem:[%s764_s2 + $0x8] sm:$0xff]  ;;  %v285_v15 = vld [vmem:[%s765_s6] sm:$0xff]  ;;  %v51_v17 = vld [vmem:[%s764_s2 + $0x18] sm:$0xff]  ;;  %v496_v5 = vlaneseq }
   0x6   :  { %267 = vperm.xlu1 %597, %v253_v9   ;;  %v286_v16 = vld [vmem:[%s765_s6 + $0x8] sm:$0xff]  ;;  %v45_v18 = vld [vmem:[%s759_s1] sm:$0xff] }
   0x7   :  { %262 = vperm.xlu0 %596, %v252_v11   ;;  %v382_v19 = vld [vmem:[%s766_s8] sm:$0xff]  ;;  %v284_v44 = vld [vmem:[%s769_s5 + $0x8] sm:$0xff]  ;;  %v497_v9 = vshrl.u32 %v496_v5, 7 }
   0x8   :  { %549 = vmatmul.mubr.msk.f32.gmra.mrb[2].mxu0 %vm56_vm0, %v55_v8  ;;  %v463_v20 = vld [vmem:[%s767_s9] sm:$0xff] }
   0x9   :  { %553 = vmatprep.mubr.msk.f32.mxu0 %vm56_vm0, %v48_v10  ;;  %v43_v21 = vld [vmem:[%s761_s0] sm:$0xff] }
   0xa   :  { %272 = vperm.xlu1 %597, %v254_v12   ;;  %v47_v22 = vmul.f32 %v45_v18, %v43_v21  ;;  %v476_v23 = vld [vmem:[%s768_s10] sm:$0xff] }
   0xb   :  { %289 = vperm.xlu0 %596, %v285_v15   ;;  %v490_v24 = vld [vmem:[#allocation2] sm:$0x1] }
   0xc   :  { %554 = vmatmul.mubr.msk.f32.vlgmr.msra.gmra.mrb[0].mxu0 %vm56_vm0, %v49_v13  ;;  %v283_v25 = vld [vmem:[%s769_s5] sm:$0xff]  ;;  %v498_v13 = vsub.s32 0, %v497_v9 }
   0xd   :  { %556 = vmatprep.mubr.msk.f32.mxu0 %vm56_vm0, %v50_v14  ;;  %567 = vmatprep.mubr.msk.f32.mxu1 %vm297_vm1, %v283_v25  ;;  %v381_v56 = vld [vmem:[%s770_s7] sm:$0xff] }
   0xe   :  { %294 = vperm.xlu1 %597, %v286_v16  }
   0xf   :  { %385 = vperm.xlu0 %596, %v382_v19  }
  0x10   :  { %557 = vmatmul.mubr.msk.f32.gmra.mrb[2].mxu0 %vm56_vm0, %v51_v17 }
  0x12   :  { %466 = vperm.xlu1 %597, %v463_v20  }
  0x13   :  { %479 = vperm.xlu0 %596, %v476_v23  }
  0x16   :  { %493 = vperm.xlu1 %597, %v490_v24  }
  0x82   :  { %v258_v26 = vpop.permute.xlu0 %257 }
  0x85   :  { %v268_v27 = vpop.permute.xlu1 %267 }
  0x86   :  { %v263_v28 = vpop.permute.xlu0 %262 }
  0x89   :  { %v273_v34 = vpop.permute.xlu1 %272 }
  0x8a   :  { %v290_v49 = vpop.permute.xlu0 %289 }
  0x8d   :  { %v295_v47 = vpop.permute.xlu1 %294 }
  0x8e   :  { %v386_v60 = vpop.permute.xlu0 %385 }
  0x91   :  { %v467_v57 = vpop.permute.xlu1 %466 }
  0x92   :  { %v469_v58 = vmul.f32 %v467_v57, %v47_v22  ;;  %v480_v2 = vpop.permute.xlu0 %479 }
  0x94   :  { %v470_v59 = vrot.slane %v469_v58, 4 }
  0x95   :  { %v494_v15 = vpop.permute.xlu1 %493 }
  0x96   :  { %v471_v62 = vadd.f32 %v470_v59, %v469_v58  ;;  %v499_v18 = vrot.slane %v494_v15, %v498_v13 }
  0x98   :  { %v472_v3 = vrot.slane %v471_v62, 2 }
  0x9a   :  { %v473_v7 = vadd.f32 %v472_v3, %v471_v62 }
  0x9c   :  { %v474_v11 = vrot.slane %v473_v7, 1 }
  0x9e   :  { %v475_v16 = vadd.f32 %v474_v11, %v473_v7 }
  0xdf   :  { %v555_v29 = vpop.f32.mrb[0].mxu0 }
  0xe0   :  { %v276_v30 = vadd.f32 %v555_v29, %v263_v28  ;;  %v232_v31 = vpop.f32.mrb[1].mxu0 }
  0xe1   :  { %v275_v32 = vadd.f32 %v258_v26, %v232_v31 }
  0xe2   :  { %v280_v33 = vmax.f32 %v276_v30, 0.0 }
  0xe3   :  { %v279_v35 = vmax.f32 %v275_v32, 0.0  ;;  %v558_v36 = vpop.f32.mrb[2].mxu0 }
  0xe4   :  { %v278_v37 = vadd.f32 %v558_v36, %v273_v34  ;;  %v242_v38 = vpop.f32.mrb[3].mxu0 }
  0xe5   :  { %v277_v39 = vadd.f32 %v268_v27, %v242_v38  ;;  %v577_v40 = vpack.c.bf16 %v280_v33, %v279_v35 }
  0xe6   :  { %v282_v41 = vmax.f32 %v278_v37, 0.0 }
  0xe7   :  { %v281_v42 = vmax.f32 %v277_v39, 0.0  ;;  %578 = vmatprep.subr.bf16.mxu1 %v577_v40 }
  0xe8   :  { %580 = vmatpush3.bf16.msra.mxu1 %v577_v40 }
  0xe9   :  { %v581_v43 = vpack.c.bf16 %v282_v41, %v281_v42 }
  0xeb   :  { %582 = vmatprep.subr.bf16.mxu1 %v581_v43 }
  0xec   :  { %584 = vmatpush3.bf16.msra.mxu1 %v581_v43 }
  0xed   :  { %585 = vmatprep.subr.bf16.mxu1 %v603_v45 }
  0xef   :  { %568 = vmatmul.mubr.msk.f32.vlgmr.msra.gmra.mrb[0].mxu1 %vm297_vm1, %v284_v44 }
  0xf0   :  { %574 = vmatprep.mubr.msk.f32.mxu1 %vm604_vm2, %v605_v46 }
 0x1c2   :  { %v569_v48 = vpop.f32.mrb[0].mxu1 }
 0x1c3   :  { %v376_v50 = vadd.f32 %v569_v48, %v295_v47  ;;  %v370_v51 = vpop.f32.mrb[1].mxu1 }
 0x1c4   :  { %v371_v52 = vadd.f32 %v370_v51, %v290_v49 }
 0x1c5   :  { %v380_v53 = vmax.f32 %v376_v50, 0.0 }
 0x1c6   :  { %v379_v54 = vmax.f32 %v371_v52, 0.0 }
 0x1c8   :  { %v586_v55 = vpack.c.bf16 %v380_v53, %v379_v54 }
 0x1ca   :  { %587 = vmatpush3.bf16.msra.mxu1 %v586_v55 }
 0x1cd   :  { %575 = vmatmul.mubr.msk.f32.vlgmr.msra.gmra.mrb[2].mxu1 %vm388_vm3, %v381_v56 }
 0x2a0   :  { %v458_v61 = vpop.f32.mrb[2].mxu1 }
 0x2a1   :  { %v459_v63 = vadd.f32 %v458_v61, %v386_v60  ;;  %v576_v0 = vpop.f32.mrb[3].mxu1 }
 0x2a3   :  { %v462_v1 = vmax.f32 %v459_v63, 0.0 }
 0x2a5   :  { %v482_v4 = vmul.f32 %v480_v2, %v462_v1 }
 0x2a7   :  { %v483_v6 = vrot.slane %v482_v4, 4 }
 0x2a9   :  { %v484_v8 = vadd.f32 %v483_v6, %v482_v4 }
 0x2ab   :  { %v485_v10 = vrot.slane %v484_v8, 2 }
 0x2ad   :  { %v486_v12 = vadd.f32 %v485_v10, %v484_v8 }
 0x2af   :  { %v487_v14 = vrot.slane %v486_v12, 1 }
 0x2b1   :  { %v488_v17 = vadd.f32 %v487_v14, %v486_v12 }
 0x2b3   :  { %v489_v19 = vadd.f32 %v488_v17, %v475_v16 }
 0x2b5   :  { %v500_v20 = vadd.f32 %v499_v18, %v489_v19 }
 0x2b7   :  { %v523_v21 = vmul.f32 -1.442695, %v500_v20 }
 0x2b9   :  { %598 = vpow2.f32 %v523_v21 }
 0x2c3   :  { %v599_v22 = vpop.eup %598 }
 0x2c4   :  { %v504_v23 = vadd.f32 1.0, %v599_v22 }
 0x2c6   :  { %600 = vrcp.f32 %v504_v23 }
 0x2d0   :  { %v601_v24 = vpop.eup %600 }
 0x2d1   :  { %507 = vst [vmem:[%s771_s12] sm:$0x1] %v601_v24 }

</bundles_post_ra>
